<compile_context>
chip_gen: v7x
topology: tpu7x:2x2x1
jax: 0.10.0
libtpu: 0.0.40
codegen_flags: <defaults>
</compile_context>

<pallas_src>
import functools

import jax
import jax.numpy as jnp
from jax.experimental import pallas as pl
from jax.experimental.pallas import tpu as pltpu

IN_FEATURES = 28 * 28     # 784
HIDDEN = 128
NUM_CLASSES = 10
PAD_CLASSES = 128          # fc2 output padded to one full lane group (unmasked vst)
NEG_BIG = -1e30            # pad-class bias -> exp() == 0 inside log_softmax


def _round_up(n, m):
    return ((n + m - 1) // m) * m


def mlp_logsoftmax_kernel(x_ref, w1_ref, b1_ref, w2_ref, b2_ref, o_ref):
    # fc1: MXU matmul with f32 accumulation. x is expected to already be bf16 (producer-side);
    # the trace-time branch keeps f32 callers correct without adding any cost to the bf16 path.
    x = x_ref[...]
    if x.dtype != jnp.bfloat16:
        x = x.astype(jnp.bfloat16)
    h = jnp.dot(x, w1_ref[...], preferred_element_type=jnp.float32)
    h = jnp.maximum(h + b1_ref[...], 0.0)

    # fc2 on lane-padded (128-wide) weights; pad columns are zero-weight with ~-inf bias.
    logits = jnp.dot(h.astype(jnp.bfloat16), w2_ref[...],
                     preferred_element_type=jnp.float32)
    logits = logits + b2_ref[...]

    # Numerically stable log_softmax over all 128 lanes. Pad lanes contribute exp() == 0 exactly
    # and can never win the max, so the result over the 10 valid classes matches the unpadded op.
    m = jnp.max(logits, axis=-1, keepdims=True)
    shifted = logits - m
    lse = jnp.log(jnp.sum(jnp.exp(shifted), axis=-1, keepdims=True))
    o_ref[...] = (shifted - lse).astype(o_ref.dtype)


@functools.partial(jax.jit, static_argnames=("tb", "out_dtype", "return_padded"))
def simple_model_forward(x, w1, b1, w2p, b2p, *, tb=2048,
                         out_dtype=jnp.float32, return_padded=False):
    """x: (B, 784) bf16 (preferred) or f32; w1: (784,128) bf16; b1: (1,128) f32;
    w2p: (128,128) bf16 (cols 10..127 zero); b2p: (1,128) f32 (cols 10..127 = -1e30).
    Returns (B, 10) log-probabilities (or the padded (B, 128) buffer if return_padded)."""
    B, K = x.shape
    assert K == IN_FEATURES

    # Batch tile:
    #  * multiple of 8 (sublane granularity)
    #  * capped so the grid has >= 2 steps whenever B allows it (keeps both v7x TCs busy)
    #  * capped at `tb` so the double-buffered x/out tiles stay comfortably inside scoped VMEM
    TB = max(8, min(_round_up(tb, 8), _round_up(pl.cdiv(B, 2), 8)))
    grid = (pl.cdiv(B, TB),)   # ragged tail handled by Pallas partial blocks; no jnp.pad copy

    x_item = jnp.dtype(x.dtype).itemsize
    out_item = jnp.dtype(out_dtype).itemsize
    weight_bytes = int(w1.size * jnp.dtype(w1.dtype).itemsize
                       + b1.size * jnp.dtype(b1.dtype).itemsize
                       + w2p.size * jnp.dtype(w2p.dtype).itemsize
                       + b2p.size * jnp.dtype(b2p.dtype).itemsize)
    # Double-buffered x / out tiles + (conservatively double-counted) resident weights + margin.
    vmem_bytes = int(2 * TB * (IN_FEATURES * x_item + PAD_CLASSES * out_item)
                     + 2 * weight_bytes + (4 << 20))

    cost = pl.CostEstimate(
        flops=2 * B * (IN_FEATURES * HIDDEN + HIDDEN * PAD_CLASSES),
        transcendentals=B * (PAD_CLASSES + 1),
        bytes_accessed=int(B * IN_FEATURES * x_item
                           + B * PAD_CLASSES * out_item
                           + weight_bytes),
    )

    out = pl.pallas_call(
        mlp_logsoftmax_kernel,
        out_shape=jax.ShapeDtypeStruct((B, PAD_CLASSES), out_dtype),
        grid=grid,
        in_specs=[
            pl.BlockSpec((TB, IN_FEATURES), lambda i: (i, 0)),        # x tile, pipelined
            pl.BlockSpec((IN_FEATURES, HIDDEN), lambda i: (0, 0)),    # w1, VMEM-resident
            pl.BlockSpec((1, HIDDEN), lambda i: (0, 0)),              # b1
            pl.BlockSpec((HIDDEN, PAD_CLASSES), lambda i: (0, 0)),    # w2 (padded)
            pl.BlockSpec((1, PAD_CLASSES), lambda i: (0, 0)),         # b2 (padded)
        ],
        out_specs=pl.BlockSpec((TB, PAD_CLASSES), lambda i: (i, 0)),
        compiler_params=pltpu.CompilerParams(
            dimension_semantics=("parallel",),
            vmem_limit_bytes=vmem_bytes),
        cost_estimate=cost,
    )(x, w1, b1, w2p, b2p)

    if return_padded:
        return out                      # (B, 128): consumer indexes lanes 0..9 itself
    return out[:, :NUM_CLASSES]         # only the lane slice remains (no batch padding to strip)


def init_params(key):
    """Deterministic init mirroring nn.Linear default (uniform +-1/sqrt(fan_in)).
    Weights are stored pre-transposed as (in_features, out_features) == torch W^T."""
    k1, k2, k3, k4 = jax.random.split(key, 4)
    lim1 = 1.0 / jnp.sqrt(IN_FEATURES)
    lim2 = 1.0 / jnp.sqrt(HIDDEN)
    w1 = jax.random.uniform(k1, (IN_FEATURES, HIDDEN), jnp.float32, -lim1, lim1)
    b1 = jax.random.uniform(k2, (1, HIDDEN), jnp.float32, -lim1, lim1)
    w2 = jax.random.uniform(k3, (HIDDEN, NUM_CLASSES), jnp.float32, -lim2, lim2)
    b2 = jax.random.uniform(k4, (1, NUM_CLASSES), jnp.float32, -lim2, lim2)
    return w1, b1, w2, b2


def pack_params_for_kernel(w1, b1, w2, b2):
    """Cast fc1/fc2 weights to bf16 and pad fc2 to 128 output lanes."""
    w1_k = w1.astype(jnp.bfloat16)
    w2_k = jnp.zeros((HIDDEN, PAD_CLASSES), jnp.bfloat16)
    w2_k = w2_k.at[:, :NUM_CLASSES].set(w2.astype(jnp.bfloat16))
    b2_k = jnp.full((1, PAD_CLASSES), NEG_BIG, jnp.float32)
    b2_k = b2_k.at[:, :NUM_CLASSES].set(b2)
    return w1_k, b1, w2_k, b2_k


if __name__ == "__main__":
    key = jax.random.PRNGKey(0)
    kx, kp = jax.random.split(key)

    w1, b1, w2, b2 = init_params(kp)
    w1_k, b1_k, w2_k, b2_k = pack_params_for_kernel(w1, b1, w2, b2)

    # Producer emits bf16 directly (no extra wrapper-side cast pass over HBM).
    B = 8
    x = jax.random.normal(kx, (B, IN_FEATURES), jnp.bfloat16)

    out = simple_model_forward(x, w1_k, b1_k, w2_k, b2_k)
    out = jax.block_until_ready(out)
    assert out.shape == (B, NUM_CLASSES)

    # Tight reference mirroring kernel numerics (bf16 MXU inputs, f32 accumulation).
    h_ref = jnp.maximum(
        jnp.dot(x, w1_k, preferred_element_type=jnp.float32) + b1, 0.0)
    logits_ref = jnp.dot(h_ref.astype(jnp.bfloat16), w2_k[:, :NUM_CLASSES],
                         preferred_element_type=jnp.float32) + b2
    ref = jax.nn.log_softmax(logits_ref, axis=1)
    assert jnp.allclose(out, ref, atol=5e-3, rtol=5e-3), float(jnp.max(jnp.abs(out - ref)))

    # Loose check against the pure-f32 (torch-equivalent) forward on the same inputs.
    x32 = x.astype(jnp.float32)
    h32 = jnp.maximum(x32 @ w1 + b1, 0.0)
    ref32 = jax.nn.log_softmax(h32 @ w2 + b2, axis=1)
    assert jnp.allclose(out, ref32, atol=5e-2, rtol=5e-2), float(jnp.max(jnp.abs(out - ref32)))

    # Ragged batch (B % TB != 0): exercised via Pallas partial blocks -- no jnp.pad copy of x.
    Br = 13
    xr = jax.random.normal(kx, (Br, IN_FEATURES), jnp.bfloat16)
    outr = jax.block_until_ready(simple_model_forward(xr, w1_k, b1_k, w2_k, b2_k))
    assert outr.shape == (Br, NUM_CLASSES)
    hr = jnp.maximum(jnp.dot(xr, w1_k, preferred_element_type=jnp.float32) + b1, 0.0)
    lr = jnp.dot(hr.astype(jnp.bfloat16), w2_k[:, :NUM_CLASSES],
                 preferred_element_type=jnp.float32) + b2
    refr = jax.nn.log_softmax(lr, axis=1)
    assert jnp.allclose(outr, refr, atol=5e-3, rtol=5e-3), float(jnp.max(jnp.abs(outr - refr)))

    print("KERNEL_OK")
</pallas_src>

<mosaic_0001>
module attributes {stable_mosaic.version = 11 : i64} {
  func.func @mlp_logsoftmax_kernel(%arg0: i32, %arg1: memref<8x784xbf16, #tpu.memory_space<vmem>>, %arg2: memref<784x128xbf16, #tpu.memory_space<vmem>>, %arg3: memref<1x128xf32, #tpu.memory_space<vmem>>, %arg4: memref<128x128xbf16, #tpu.memory_space<vmem>>, %arg5: memref<1x128xf32, #tpu.memory_space<vmem>>, %arg6: memref<8x128xf32, #tpu.memory_space<vmem>>) attributes {dimension_semantics = [#tpu.dimension_semantics<parallel>], iteration_bounds = array<i64: 1>, scalar_prefetch = 0 : i64, scratch_operands = 0 : i64, tpu.core_type = #tpu.core_type<tc>, window_params = [{transform_indices = @transform_0, window_bounds = array<i64: 8, 784>}, {pipeline_mode = #tpu.pipeline_mode<synchronous>, transform_indices = @transform_1, window_bounds = array<i64: 784, 128>}, {pipeline_mode = #tpu.pipeline_mode<synchronous>, transform_indices = @transform_2, window_bounds = array<i64: 1, 128>}, {pipeline_mode = #tpu.pipeline_mode<synchronous>, transform_indices = @transform_3, window_bounds = array<i64: 128, 128>}, {pipeline_mode = #tpu.pipeline_mode<synchronous>, transform_indices = @transform_4, window_bounds = array<i64: 1, 128>}, {transform_indices = @transform_5, window_bounds = array<i64: 8, 128>}]} {
    %c0 = arith.constant 0 : index
    %c0_0 = arith.constant 0 : index
    %0 = vector.load %arg1[%c0, %c0_0] : memref<8x784xbf16, #tpu.memory_space<vmem>>, vector<8x784xbf16>
    %c0_1 = arith.constant 0 : index
    %c0_2 = arith.constant 0 : index
    %1 = vector.load %arg2[%c0_1, %c0_2] : memref<784x128xbf16, #tpu.memory_space<vmem>>, vector<784x128xbf16>
    %cst = arith.constant dense<0.000000e+00> : vector<8x128xf32>
    %2 = tpu.matmul %0, %1, %cst {dimension_numbers = #tpu.dot_dimension_numbers<[1], [0], [0], [1], [0, 0, 1, 1], [], []>} : vector<8x784xbf16>, vector<784x128xbf16>, vector<8x128xf32> -> vector<8x128xf32>
    %c0_3 = arith.constant 0 : index
    %c0_4 = arith.constant 0 : index
    %3 = vector.load %arg3[%c0_3, %c0_4] : memref<1x128xf32, #tpu.memory_space<vmem>>, vector<1x128xf32>
    %4 = vector.broadcast %3 : vector<1x128xf32> to vector<8x128xf32>
    %5 = arith.addf %2, %4 : vector<8x128xf32>
    %cst_5 = arith.constant 0.000000e+00 : f32
    %6 = vector.broadcast %cst_5 : f32 to vector<8x128xf32>
    %7 = arith.maximumf %5, %6 : vector<8x128xf32>
    %8 = arith.truncf %7 : vector<8x128xf32> to vector<8x128xbf16>
    %c0_6 = arith.constant 0 : index
    %c0_7 = arith.constant 0 : index
    %9 = vector.load %arg4[%c0_6, %c0_7] : memref<128x128xbf16, #tpu.memory_space<vmem>>, vector<128x128xbf16>
    %cst_8 = arith.constant dense<0.000000e+00> : vector<8x128xf32>
    %10 = tpu.matmul %8, %9, %cst_8 {dimension_numbers = #tpu.dot_dimension_numbers<[1], [0], [0], [1], [0, 0, 1, 1], [], []>} : vector<8x128xbf16>, vector<128x128xbf16>, vector<8x128xf32> -> vector<8x128xf32>
    %c0_9 = arith.constant 0 : index
    %c0_10 = arith.constant 0 : index
    %11 = vector.load %arg5[%c0_9, %c0_10] : memref<1x128xf32, #tpu.memory_space<vmem>>, vector<1x128xf32>
    %12 = vector.broadcast %11 : vector<1x128xf32> to vector<8x128xf32>
    %13 = arith.addf %10, %12 : vector<8x128xf32>
    %cst_11 = arith.constant dense<0xFF800000> : vector<8xf32>
    %14 = vector.multi_reduction <maximumf>, %13, %cst_11 [1] : vector<8x128xf32> to vector<8xf32>
    %15 = vector.shape_cast %14 : vector<8xf32> to vector<8x1xf32>
    %16 = vector.broadcast %15 : vector<8x1xf32> to vector<8x128xf32>
    %17 = arith.subf %13, %16 : vector<8x128xf32>
    %18 = math.exp %17 : vector<8x128xf32>
    %cst_12 = arith.constant dense<0.000000e+00> : vector<8xf32>
    %19 = vector.multi_reduction <add>, %18, %cst_12 [1] : vector<8x128xf32> to vector<8xf32>
    %20 = vector.shape_cast %19 : vector<8xf32> to vector<8x1xf32>
    %21 = math.log %20 : vector<8x1xf32>
    %22 = vector.broadcast %21 : vector<8x1xf32> to vector<8x128xf32>
    %23 = arith.subf %17, %22 : vector<8x128xf32>
    %c0_13 = arith.constant 0 : index
    %c0_14 = arith.constant 0 : index
    %24 = vector.load %arg6[%c0_13, %c0_14] : memref<8x128xf32, #tpu.memory_space<vmem>>, vector<8x128xf32>
    tpu.vector_store %arg6[%c0_13, %c0_14], %23 {strides = array<i32>} : memref<8x128xf32, #tpu.memory_space<vmem>>, vector<8x128xf32>,
    return
  }
  func.func @transform_0(%arg0: i32) -> (i32, i32) {
    %c0_i32 = arith.constant 0 : i32
    %c0_i32_0 = arith.constant 0 : i32
    return %arg0, %c0_i32 : i32, i32
  }
  func.func @transform_1(%arg0: i32) -> (i32, i32) {
    %c0_i32 = arith.constant 0 : i32
    %c0_i32_0 = arith.constant 0 : i32
    %c0_i32_1 = arith.constant 0 : i32
    return %c0_i32, %c0_i32_0 : i32, i32
  }
  func.func @transform_2(%arg0: i32) -> (i32, i32) {
    %c0_i32 = arith.constant 0 : i32
    %c0_i32_0 = arith.constant 0 : i32
    %c0_i32_1 = arith.constant 0 : i32
    return %c0_i32, %c0_i32_0 : i32, i32
  }
  func.func @transform_3(%arg0: i32) -> (i32, i32) {
    %c0_i32 = arith.constant 0 : i32
    %c0_i32_0 = arith.constant 0 : i32
    %c0_i32_1 = arith.constant 0 : i32
    return %c0_i32, %c0_i32_0 : i32, i32
  }
  func.func @transform_4(%arg0: i32) -> (i32, i32) {
    %c0_i32 = arith.constant 0 : i32
    %c0_i32_0 = arith.constant 0 : i32
    %c0_i32_1 = arith.constant 0 : i32
    return %c0_i32, %c0_i32_0 : i32, i32
  }
  func.func @transform_5(%arg0: i32) -> (i32, i32) {
    %c0_i32 = arith.constant 0 : i32
    %c0_i32_0 = arith.constant 0 : i32
    return %arg0, %c0_i32 : i32, i32
  }
}

</mosaic_0001>

<bundles_post_ra>
// kernel: simple_model_forward.1
= control target key start
LH: loop header
LB: loop body
LE: loop exit
PB: predicated region body
PF: predicated region fallthrough
CT: control target
= control target key end

     0   :  { %10 = vsyncpa [#allocation3], 0  ;;  %s1232_s0 = inlined_call_operand.hbm [shape: bf16[8,784], index: 0, kind: input, shape index: {}]   ;;  %s1233_s1 = inlined_call_operand.hbm [shape: bf16[784,128], index: 1, kind: input, shape index: {}]   ;;  %s1234_s2 = inlined_call_operand.vmem [shape: f32[1,128], index: 2, kind: input, shape index: {}]   ;;  %s1235_s3 = inlined_call_operand.hbm [shape: bf16[128,128], index: 3, kind: input, shape index: {}]   ;;  %s1236_s4 = inlined_call_operand.vmem [shape: f32[1,128], index: 4, kind: input, shape index: {}]   ;;  %s1237_s5 = inlined_call_operand.hbm [shape: f32[8,128], index: 5, kind: output, shape index: {}]  }
   0x1   :  { %11 = vsyncpa [#allocation6], 0 }
   0x2   :  { %12 = vsyncpa [#allocation4], 0  ;;  %s1132_s18 = smov [#allocation5]   ;;  %s1038_s22 = scalar_lea.hbm %s1233_s1, 6272 }
   0x3   :  { %s28_s19 = sshll.u32 %s1132_s18, 4  ;;  %p1039_p0 = scmp.ne.s32.totalorder %s1233_s1, %s1038_s22  ;;  %s29_s19 = int_to_ptr.vmem [resolvable:$true] %s28_s19 }
   0x4   :  { %p1042_p1 = scmp.lt.u32.totalorder %s1038_s22, %s1233_s1 }
   0x6   :  { %p1044_p2 = pnand %p1042_p1, %p1039_p0 }
   0x8   :  { %1047 = shalt.err (!%p1044_p2)
}
   0x9   :  { %s1048_s27 = scalar_lea.vmem %s29_s19, 6272  ;;  %p1053_p4 = scmp.lt.s32.totalorder %s29_s19, %s29_s19 }
   0xa   :  { %p1049_p3 = scmp.ne.s32.totalorder %s29_s19, %s1048_s27  ;;  %p1054_p5 = scmp.lt.s32.totalorder %s1048_s27, %s1048_s27 }
   0xc   :  { %p1055_p6 = por %p1054_p5, %p1053_p4 }
   0xe   :  { %p1056_p7 = pnand %p1055_p6, %p1049_p3 }
  0x10   :  { %1059 = shalt.err (!%p1056_p7)
}
  0x11   :  { %s1133_s28 = smov 64   ;;  %s1134_s29 = smov 4  }
  0x12   :  { %34 = dma.hbm_to_vmem [thread:$0]  %s1233_s1, 6272, %s29_s19, [#allocation6], %s1133_s28, %s1133_s28, %s1134_s29  }
  0x13   :  { %s1135_s7 = smov [#allocation2]   ;;  %s1136_s9 = smov [#allocation7]  }
  0x14   :  { %s19_s8 = sshll.u32 %s1135_s7, 4  ;;  %s42_s10 = sshll.u32 %s1136_s9, 4  ;;  %s20_s8 = int_to_ptr.vmem [resolvable:$true] %s19_s8  ;;  %s43_s10 = int_to_ptr.vmem [resolvable:$true] %s42_s10 }
  0x15   :  { %s1060_s13 = scalar_lea.hbm %s1232_s0, 448 }
  0x16   :  { %p1061_p8 = scmp.ne.s32.totalorder %s1232_s0, %s1060_s13  ;;  %p1064_p9 = scmp.lt.u32.totalorder %s1060_s13, %s1232_s0 }
  0x18   :  { %p1066_p10 = pnand %p1064_p9, %p1061_p8 }
  0x1a   :  { %1069 = shalt.err (!%p1066_p10)
}
  0x1b   :  { %s1070_s1 = scalar_lea.vmem %s20_s8, 448  ;;  %p1075_p12 = scmp.lt.s32.totalorder %s20_s8, %s20_s8 }
  0x1c   :  { %p1071_p11 = scmp.ne.s32.totalorder %s20_s8, %s1070_s1  ;;  %p1076_p13 = scmp.lt.s32.totalorder %s1070_s1, %s1070_s1 }
  0x1e   :  { %p1077_p0 = por %p1076_p13, %p1075_p12 }
  0x20   :  { %p1078_p1 = pnand %p1077_p0, %p1071_p11 }
  0x22   :  { %1081 = shalt.err (!%p1078_p1)
}
  0x23   :  { %22 = dma.hbm_to_vmem [thread:$0]  %s1232_s0, 448, %s20_s8, [#allocation3]  }
  0x24   :  { %s1082_s22 = scalar_lea.hbm %s1235_s3, 1024 }
  0x25   :  { %p1083_p2 = scmp.ne.s32.totalorder %s1235_s3, %s1082_s22  ;;  %p1086_p3 = scmp.lt.u32.totalorder %s1082_s22, %s1235_s3 }
  0x27   :  { %p1088_p4 = pnand %p1086_p3, %p1083_p2 }
  0x29   :  { %1091 = shalt.err (!%p1088_p4)
}
  0x2a   :  { %s1092_s27 = scalar_lea.vmem %s43_s10, 1024  ;;  %p1097_p6 = scmp.lt.s32.totalorder %s43_s10, %s43_s10 }
  0x2b   :  { %p1093_p5 = scmp.ne.s32.totalorder %s43_s10, %s1092_s27  ;;  %p1098_p7 = scmp.lt.s32.totalorder %s1092_s27, %s1092_s27 }
  0x2d   :  { %p1099_p8 = por %p1098_p7, %p1097_p6 }
  0x2f   :  { %p1100_p9 = pnand %p1099_p8, %p1093_p5 }
  0x31   :  { %1103 = shalt.err (!%p1100_p9)
}
  0x32   :  { %48 = dma.hbm_to_vmem [thread:$0]  %s1235_s3, 1024, %s43_s10, [#allocation6], %s1133_s28, %s1133_s28, %s1134_s29  }
  0x33   :  { %1126 = dma.done.wait [#allocation3], 448  }
  0x34   :  { %1127 = vsyncadd [#allocation3], 4294966848 }
  0x35   :  { %1128 = dma.done.wait [#allocation6], 7296  }
  0x36   :  { %1129 = vsyncadd [#allocation6], 4294960000  ;;  %v970_v0 = vld [vmem:[#allocation5 + $0x40] sm:$0xff]   ;;  %v974_v4 = vld [vmem:[#allocation5 + $0x48] sm:$0xff]   ;;  %v1137_v43 = vmov 0.0   ;;  %vm1138_vm0 = vmmov 0  }
  0x37   :  { %v971_v1 = vld [vmem:[#allocation5] sm:$0xff]   ;;  %859 = vmatprep.subr.bf16.mxu0 %v970_v0  ;;  %v975_v5 = vld [vmem:[#allocation5 + $0x8] sm:$0xff]   ;;  %v978_v8 = vld [vmem:[#allocation5 + $0x50] sm:$0xff]   ;;  %vm488_vm1 = vcmask 130048   ;;  %s1139_s6 = smov [#allocation8]  }
  0x38   :  { %v972_v2 = vld [vmem:[#allocation5 + $0xc0] sm:$0xff]   ;;  %860 = vmatpush3.bf16.msra.mxu0 %v971_v1  ;;  %v976_v6 = vld [vmem:[#allocation5 + $0xc8] sm:$0xff]   ;;  %v979_v9 = vld [vmem:[#allocation5 + $0x10] sm:$0xff]   ;;  %s782_s7 = sshll.u32 %s1139_s6, 4  ;;  %s783_s7 = int_to_ptr.vmem [resolvable:$true] %s782_s7 }
  0x39   :  { %v973_v3 = vld [vmem:[#allocation5 + $0x80] sm:$0xff]   ;;  %881 = vmatprep.subr.bf16.mxu1 %v972_v2  ;;  %861 = vmatprep.subr.bf16.mxu0 %v974_v4  ;;  %v977_v7 = vld [vmem:[#allocation5 + $0x88] sm:$0xff]   ;;  %v980_v10 = vld [vmem:[#allocation5 + $0xd0] sm:$0xff]   ;;  %p1109_p11 = scmp.lt.s32.totalorder %s783_s7, %s783_s7 }
  0x3a   :  { %882 = vmatpush3.bf16.msra.mxu1 %v973_v3  ;;  %v981_v11 = vld [vmem:[#allocation5 + $0x90] sm:$0xff]   ;;  %v982_v12 = vld [vmem:[#allocation5 + $0x58] sm:$0xff]   ;;  %v986_v16 = vld [vmem:[#allocation5 + $0x60] sm:$0xff]  }
  0x3b   :  { %883 = vmatprep.subr.bf16.mxu1 %v976_v6  ;;  %v983_v13 = vld [vmem:[#allocation5 + $0x18] sm:$0xff]   ;;  %v987_v17 = vld [vmem:[#allocation5 + $0x20] sm:$0xff]   ;;  %v990_v20 = vld [vmem:[#allocation5 + $0x68] sm:$0xff]  }
  0x3c   :  { %862 = vmatpush3.bf16.msra.mxu0 %v975_v5  ;;  %v984_v14 = vld [vmem:[#allocation5 + $0xd8] sm:$0xff]   ;;  %v988_v18 = vld [vmem:[#allocation5 + $0xe0] sm:$0xff]   ;;  %v991_v21 = vld [vmem:[#allocation5 + $0x28] sm:$0xff]  }
  0x3d   :  { %863 = vmatprep.subr.bf16.mxu0 %v978_v8  ;;  %v985_v15 = vld [vmem:[#allocation5 + $0x98] sm:$0xff]   ;;  %v989_v19 = vld [vmem:[#allocation5 + $0xa0] sm:$0xff]   ;;  %v992_v22 = vld [vmem:[#allocation5 + $0xe8] sm:$0xff]  }
  0x3e   :  { %884 = vmatpush3.bf16.msra.mxu1 %v977_v7  ;;  %v993_v23 = vld [vmem:[#allocation5 + $0xa8] sm:$0xff]   ;;  %v994_v24 = vld [vmem:[#allocation5 + $0x70] sm:$0xff]   ;;  %v998_v28 = vld [vmem:[#allocation5 + $0x78] sm:$0xff]  }
  0x3f   :  { %885 = vmatprep.subr.bf16.mxu1 %v980_v10  ;;  %v995_v25 = vld [vmem:[#allocation5 + $0x30] sm:$0xff]   ;;  %v999_v29 = vld [vmem:[#allocation5 + $0x38] sm:$0xff]   ;;  %v61_v31 = vld [vmem:[#allocation2] sm:$0xff] }
  0x40   :  { %864 = vmatpush3.bf16.msra.mxu0 %v979_v9  ;;  %v996_v26 = vld [vmem:[#allocation5 + $0xf0] sm:$0xff]   ;;  %v1000_v30 = vld [vmem:[#allocation5 + $0xf8] sm:$0xff]   ;;  %v793_v32 = vcombine.low %v61_v31, %v61_v31  ;;  %v794_v33 = vcombine.high %v61_v31, %v61_v31  ;;  %v1004_v35 = vld [vmem:[#allocation5 + $0x140] sm:$0xff]  }
  0x41   :  { %865 = vmatprep.subr.bf16.mxu0 %v982_v12  ;;  %v997_v27 = vld [vmem:[#allocation5 + $0xb0] sm:$0xff]   ;;  %v1003_v34 = vld [vmem:[#allocation5 + $0xb8] sm:$0xff]   ;;  %v1007_v39 = vld [vmem:[#allocation5 + $0x100] sm:$0xff]  }
  0x42   :  { %886 = vmatpush3.bf16.msra.mxu1 %v981_v11  ;;  %v62_v36 = vld [vmem:[#allocation2 + $0x8] sm:$0xff]  ;;  %524 = vmatprep.mubr.bf16.mxu0 %v794_v33  ;;  %v1012_v45 = vld [vmem:[#allocation5 + $0x158] sm:$0xff]   ;;  %v1014_v47 = vld [vmem:[#allocation5 + $0x160] sm:$0xff]  }
  0x43   :  { %887 = vmatprep.subr.bf16.mxu1 %v984_v14  ;;  %v795_v37 = vcombine.low %v62_v36, %v62_v36  ;;  %v796_v38 = vcombine.high %v62_v36, %v62_v36  ;;  %v1008_v40 = vld [vmem:[#allocation5 + $0x148] sm:$0xff]   ;;  %v1010_v42 = vld [vmem:[#allocation5 + $0x150] sm:$0xff]   ;;  %v1013_v46 = vld [vmem:[#allocation5 + $0x118] sm:$0xff]  }
  0x44   :  { %866 = vmatpush3.bf16.msra.mxu0 %v983_v13  ;;  %v1009_v41 = vld [vmem:[#allocation5 + $0x108] sm:$0xff]   ;;  %v1011_v44 = vld [vmem:[#allocation5 + $0x110] sm:$0xff]   ;;  %v1015_v48 = vld [vmem:[#allocation5 + $0x120] sm:$0xff]  }
  0x45   :  { %867 = vmatprep.subr.bf16.mxu0 %v986_v16  ;;  %564 = vmatprep.mubr.bf16.mxu1 %v796_v38  ;;  %v1016_v49 = vld [vmem:[#allocation5 + $0x168] sm:$0xff]   ;;  %v1022_v50 = vld [vmem:[#allocation5 + $0x180] sm:$0xff]   ;;  %v63_v51 = vld [vmem:[#allocation2 + $0x10] sm:$0xff] }
  0x46   :  { %888 = vmatpush3.bf16.msra.mxu1 %v985_v15  ;;  %v1017_v52 = vld [vmem:[#allocation5 + $0x128] sm:$0xff]   ;;  %v798_v53 = vcombine.high %v63_v51, %v63_v51  ;;  %v1025_v54 = vld [vmem:[#allocation2 + $0x18] ss:$0 sps:$4 sm:$0xff]   ;;  %v1018_v55 = vld [vmem:[#allocation5 + $0x170] sm:$0xff]   ;;  %v797_v59 = vcombine.low %v63_v51, %v63_v51 }
  0x47   :  { %889 = vmatprep.subr.bf16.mxu1 %v988_v18  ;;  %v1019_v56 = vld [vmem:[#allocation5 + $0x130] sm:$0xff]   ;;  %v1020_v57 = vld [vmem:[#allocation5 + $0x178] sm:$0xff]   ;;  %v1026_v60 = vld [vmem:[#allocation7] sm:$0xff]  }
  0x48   :  { %868 = vmatpush3.bf16.msra.mxu0 %v987_v17  ;;  %v1021_v58 = vld [vmem:[#allocation5 + $0x138] sm:$0xff]   ;;  %v1027_v61 = vld [vmem:[#allocation7 + $0x8] sm:$0xff]   ;;  %v1029_v63 = vld [vmem:[#allocation7 + $0x18] sm:$0xff]  }
  0x49   :  { %869 = vmatprep.subr.bf16.mxu0 %v990_v20  ;;  %v1028_v62 = vld [vmem:[#allocation7 + $0x10] sm:$0xff]   ;;  %v1030_v0 = vld [vmem:[#allocation7 + $0x20] sm:$0xff]   ;;  %v1031_v1 = vld [vmem:[#allocation7 + $0x28] sm:$0xff]  }
  0x4a   :  { %890 = vmatpush3.bf16.msra.mxu1 %v989_v19  ;;  %v1032_v2 = vld [vmem:[#allocation7 + $0x30] sm:$0xff]   ;;  %v1033_v3 = vld [vmem:[#allocation7 + $0x38] sm:$0xff]  }
  0x4b   :  { %891 = vmatprep.subr.bf16.mxu1 %v992_v22  ;;  %v792_v5 = vld [vmem:[%s1234_s2] ss:$0 sm:$0xff] }
  0x4c   :  { %870 = vmatpush3.bf16.msra.mxu0 %v991_v21 }
  0x4d   :  { %871 = vmatprep.subr.bf16.mxu0 %v994_v24 }
  0x4e   :  { %892 = vmatpush3.bf16.msra.mxu1 %v993_v23 }
  0x4f   :  { %893 = vmatprep.subr.bf16.mxu1 %v996_v26 }
  0x50   :  { %872 = vmatpush3.bf16.msra.mxu0 %v995_v25 }
  0x51   :  { %873 = vmatprep.subr.bf16.mxu0 %v998_v28 }
  0x52   :  { %894 = vmatpush3.bf16.msra.mxu1 %v997_v27 }
  0x53   :  { %895 = vmatprep.subr.bf16.mxu1 %v1000_v30  ;;  %v850_v30 = vld [vmem:[%s1236_s4] ss:$0 sm:$0xff]  ;;  %s1104_s4 = scalar_lea.vmem %s783_s7, 128 }
  0x54   :  { %874 = vmatpush3.bf16.msra.mxu0 %v999_v29  ;;  %p1105_p10 = scmp.ne.s32.totalorder %s783_s7, %s1104_s4  ;;  %p1110_p12 = scmp.lt.s32.totalorder %s1104_s4, %s1104_s4 }
  0x55   :  { %903 = vmatprep.subr.bf16.mxu0 %v1004_v35 }
  0x56   :  { %896 = vmatpush3.bf16.msra.mxu1 %v1003_v34  ;;  %p1111_p13 = por %p1110_p12, %p1109_p11 }
  0x57   :  { %525 = vmatmul.mubr.bf16.vlgmr.msra.gmra.mrb[0].mxu0 %v793_v32  ;;  %936 = vmatprep.subr.bf16.mxu1 %v1137_v43 }
  0x58   :  { %904 = vmatpush3.bf16.msra.mxu0 %v1007_v39  ;;  %604 = vmatprep.mubr.bf16.mxu0 %v798_v53  ;;  %p1112_p0 = pnand %p1111_p13, %p1105_p10 }
  0x59   :  { %565 = vmatmul.mubr.bf16.vlgmr.msra.gmra.mrb[0].mxu1 %v795_v37  ;;  %905 = vmatprep.subr.bf16.mxu0 %v1008_v40 }
  0x5a   :  { %938 = vmatprep.mubr.msk.bf16.mxu1 %vm1138_vm0, %v1137_v43  ;;  %937 = vmatpush3.bf16.msra.mxu1 %v1022_v50 }
  0x5b   :  { %942 = vmatprep.subr.bf16.mxu1 %v1137_v43 }
  0x5c   :  { %906 = vmatpush3.bf16.msra.mxu0 %v1009_v41 }
  0x5d   :  { %907 = vmatprep.subr.bf16.mxu0 %v1010_v42 }
  0x60   :  { %908 = vmatpush3.bf16.msra.mxu0 %v1011_v44 }
  0x61   :  { %909 = vmatprep.subr.bf16.mxu0 %v1012_v45  ;;  %939 = vmatmul.mubr.msk.bf16.vlgmr.msra.gmra.mrb[4].mxu1 %vm488_vm1, %v1025_v54 }
  0x62   :  { %958 = vmatprep.mubr.msk.bf16.mxu1 %vm1138_vm0, %v1137_v43  ;;  %943 = vmatpush3.bf16.msra.mxu1 %v1026_v60 }
  0x63   :  { %944 = vmatprep.subr.bf16.mxu1 %v1137_v43 }
  0x64   :  { %910 = vmatpush3.bf16.msra.mxu0 %v1013_v46 }
  0x65   :  { %911 = vmatprep.subr.bf16.mxu0 %v1014_v47 }
  0x66   :  { %945 = vmatpush3.bf16.msra.mxu1 %v1027_v61 }
  0x67   :  { %946 = vmatprep.subr.bf16.mxu1 %v1137_v43 }
  0x68   :  { %912 = vmatpush3.bf16.msra.mxu0 %v1015_v48 }
  0x69   :  { %913 = vmatprep.subr.bf16.mxu0 %v1016_v49 }
  0x6a   :  { %947 = vmatpush3.bf16.msra.mxu1 %v1028_v62 }
  0x6b   :  { %948 = vmatprep.subr.bf16.mxu1 %v1137_v43 }
  0x6c   :  { %914 = vmatpush3.bf16.msra.mxu0 %v1017_v52 }
  0x6d   :  { %915 = vmatprep.subr.bf16.mxu0 %v1018_v55 }
  0x6e   :  { %949 = vmatpush3.bf16.msra.mxu1 %v1029_v63 }
  0x6f   :  { %950 = vmatprep.subr.bf16.mxu1 %v1137_v43 }
  0x70   :  { %916 = vmatpush3.bf16.msra.mxu0 %v1019_v56 }
  0x71   :  { %917 = vmatprep.subr.bf16.mxu0 %v1020_v57 }
  0x72   :  { %951 = vmatpush3.bf16.msra.mxu1 %v1030_v0 }
  0x73   :  { %952 = vmatprep.subr.bf16.mxu1 %v1137_v43 }
  0x74   :  { %918 = vmatpush3.bf16.msra.mxu0 %v1021_v58 }
  0x76   :  { %953 = vmatpush3.bf16.msra.mxu1 %v1031_v1 }
  0x77   :  { %605 = vmatmul.mubr.bf16.vlgmr.msra.gmra.mrb[4].mxu0 %v797_v59  ;;  %954 = vmatprep.subr.bf16.mxu1 %v1137_v43 }
  0x7a   :  { %955 = vmatpush3.bf16.msra.mxu1 %v1032_v2 }
  0x7b   :  { %956 = vmatprep.subr.bf16.mxu1 %v1137_v43 }
  0x7e   :  { %957 = vmatpush3.bf16.msra.mxu1 %v1033_v3 }
 0x12a   :  { %v875_v4 = vpop.f32.mrb[0].mxu0 }
 0x12b   :  { %v876_v6 = vpop.f32.mrb[1].mxu0 }
 0x12c   :  { %v877_v7 = vadd.f32 %v876_v6, %v875_v4  ;;  %v878_v8 = vpop.f32.mrb[2].mxu0  ;;  %v897_v9 = vpop.f32.mrb[0].mxu1 }
 0x12d   :  { %v879_v10 = vpop.f32.mrb[3].mxu0  ;;  %v898_v11 = vpop.f32.mrb[1].mxu1 }
 0x12e   :  { %v527_v12 = vadd.f32 %v877_v7, %v792_v5  ;;  %v899_v13 = vadd.f32 %v898_v11, %v897_v9  ;;  %v900_v14 = vpop.f32.mrb[2].mxu1 }
 0x12f   :  { %v901_v15 = vpop.f32.mrb[3].mxu1 }
 0x130   :  { %v567_v16 = vadd.f32 %v899_v13, %v527_v12 }
 0x134   :  { %v646_v17 = vpop.f32.mrb[4].mxu1 }
 0x135   :  { %v940_v18 = vpop.f32.mrb[5].mxu1 }
 0x136   :  { %v649_v19 = vpop.f32.mrb[6].mxu1 }
 0x137   :  { %v941_v20 = vpop.f32.mrb[7].mxu1 }
 0x14a   :  { %v919_v21 = vpop.f32.mrb[4].mxu0 }
 0x14b   :  { %v920_v22 = vpop.f32.mrb[5].mxu0 }
 0x14c   :  { %v921_v23 = vadd.f32 %v920_v22, %v919_v21  ;;  %v922_v24 = vpop.f32.mrb[6].mxu0 }
 0x14d   :  { %v923_v25 = vpop.f32.mrb[7].mxu0 }
 0x14e   :  { %v607_v26 = vadd.f32 %v921_v23, %v567_v16 }
 0x150   :  { %v647_v27 = vadd.f32 %v646_v17, %v607_v26 }
 0x152   :  { %v652_v28 = vmax.f32 %v647_v27, 0.0 }
 0x154   :  { %v653_v29 = vpack.c.bf16 %v652_v28, %v652_v28 }
 0x156   :  { %959 = vmatmul.mubr.bf16.vlgmr.msra.gmra.mrb[8].mxu1 %v653_v29 }
 0x229   :  { %v759_v31 = vpop.f32.mrb[8].mxu1 }
 0x22a   :  { %v760_v32 = vadd.f32 %v850_v30, %v759_v31  ;;  %v960_v33 = vpop.f32.mrb[9].mxu1 }
 0x22b   :  { %v762_v34 = vpop.f32.mrb[10].mxu1 }
 0x22c   :  { %765 = vmax.xlane.f32.xlu0 %v760_v32  ;;  %v961_v35 = vpop.f32.mrb[11].mxu1 }
 0x2b9   :  { %v766_v36 = vpop.xlane.xlu0 %765 }
 0x2ba   :  { %v767_v37 = vsub.f32 %v760_v32, %v766_v36 }
 0x2bc   :  { %v768_v38 = vmul.f32 1.442695, %v767_v37 }
 0x2be   :  { %1034 = vpow2.f32 %v768_v38 }
 0x2c8   :  { %v1035_v39 = vpop.eup %1034 }
 0x2c9   :  { %770 = vadd.xlane.f32.xlu0 %v1035_v39 }
 0x356   :  { %v771_v40 = vpop.xlane.xlu0 %770 }
 0x357   :  { %1036 = vlog2.f32 %v771_v40 }
 0x361   :  { %v1037_v41 = vpop.eup %1036 }
 0x362   :  { %v773_v42 = vmul.f32 0.6931472, %v1037_v41 }
 0x364   :  { %v774_v43 = vsub.f32 %v767_v37, %v773_v42 }
 0x366   :  { %775 = vst [vmem:[#allocation8] sm:$0xff] %v774_v43 }
 0x367   :  { %1115 = shalt.err (!%p1112_p0)
}
 0x368   :  { %s1116_s10 = scalar_lea.hbm %s1237_s5, 128 }
 0x369   :  { %p1117_p1 = scmp.ne.s32.totalorder %s1237_s5, %s1116_s10  ;;  %p1120_p2 = scmp.lt.u32.totalorder %s1116_s10, %s1237_s5 }
 0x36b   :  { %p1122_p3 = pnand %p1120_p2, %p1117_p1 }
 0x36d   :  { %1125 = shalt.err (!%p1122_p3)
}
 0x36e   :  { %785 = dma.vmem_to_hbm [thread:$0]  %s783_s7, 128, %s1237_s5, [#allocation4]  }
 0x36f   :  { %1130 = dma.done.wait [#allocation4], 128  }
 0x370   :  { %1131 = vsyncadd [#allocation4], 4294967168 }
 0x371   :  { %789 = vsyncpa [#allocation3], 1 }
 0x372   :  { %790 = vsyncpa [#allocation6], 1 }
 0x373   :  { %791 = vsyncpa [#allocation4], 1 }

</bundles_post_ra>
